<compile_context>
chip_gen: v7x
topology: tpu7x:2x2x1
jax: 0.10.0
libtpu: 0.0.40
codegen_flags: <defaults>
</compile_context>

<pallas_src>
import math

import jax
import jax.numpy as jnp
from jax.experimental import pallas as pl
from jax.experimental.pallas import tpu as pltpu

# TODO(synk): readConfig() reads a config file; replaced by in-script constants.
FEALENGTH = 2
FEATOTALLEN = 1 + 2 + FEALENGTH * 2 + 2 + FEALENGTH * 3   # = 15 (state_dim)
SCORE_WINSIZE = 2
STATESIZE = SCORE_WINSIZE * 4                              # = 8
BATCH_SIZE = 2
HIDDEN_DIM = 1                                             # hard-coded in __init__


# ----------------------------------------------------------------------------
# Kernel
# ----------------------------------------------------------------------------
def critic_kernel(state_ref, action_ref, params_ref, out_ref):
    B, S, D = state_ref.shape
    Sp1 = S + 1

    # --- unpack the single packed parameter tile with static slices ---------
    w3t = params_ref[:Sp1, :Sp1]                 # (S+1, S+1) = ln3.weight.T
    w1  = params_ref[Sp1:Sp1 + 1, :D]            # (1, D)     = ln1.weight row
    b3  = params_ref[Sp1 + 1:Sp1 + 2, :Sp1]      # (1, S+1)   = ln3.bias
    w4  = params_ref[Sp1 + 2:Sp1 + 3, :Sp1]      # (1, S+1)   = ln4.weight row
    b1  = params_ref[Sp1 + 3:Sp1 + 4, 0:1]       # (1, 1)     = ln1.bias
    b4  = params_ref[Sp1 + 3:Sp1 + 4, 1:2]       # (1, 1)     = ln4.bias

    # --- ln1 (out_features == 1) applied to state rows and to (action + 1) --
    # Equivalent to ln1(cat(state, action[:,None,:]+1, dim=-2)); the concat
    # is done on the (B, S+1) hidden vector instead of a 3-D sublane concat.
    h_state = jnp.sum(state_ref[...] * w1[None, :, :], axis=-1)        # (B, S)
    h_act = jnp.sum((action_ref[...] + 1.0) * w1, axis=-1,
                    keepdims=True)                                     # (B, 1)
    h = jnp.maximum(jnp.concatenate([h_state, h_act], axis=-1) + b1,
                    0.0)                                               # (B, S+1)

    # --- ln3 + ReLU: one small MXU matmul (K = S+1 = 9) ---------------------
    r3 = jnp.maximum(
        jnp.dot(h, w3t, preferred_element_type=jnp.float32) + b3, 0.0)  # (B,S+1)

    # --- ln4 (out_features == 1): VPU multiply + lane reduce ----------------
    out_ref[...] = jnp.sum(r3 * w4, axis=-1, keepdims=True) + b4        # (B,1)


# ----------------------------------------------------------------------------
# Parameter init (PyTorch semantics) and one-time packing
# ----------------------------------------------------------------------------
def init_critic_params(key, state_dim, state_size):
    """initParams(): every 'weight' ~ N(0, 0.01); biases keep nn.Linear default."""
    Sp1 = state_size + 1
    ks = jax.random.split(key, 6)

    def default_bias(k, fan_in, shape):
        bound = 1.0 / math.sqrt(fan_in)
        return jax.random.uniform(k, shape, jnp.float32, -bound, bound)

    w1 = 0.01 * jax.random.normal(ks[0], (HIDDEN_DIM, state_dim), jnp.float32)
    b1 = default_bias(ks[1], state_dim, (HIDDEN_DIM,))
    w3 = 0.01 * jax.random.normal(ks[2], (Sp1, Sp1), jnp.float32)
    b3 = default_bias(ks[3], Sp1, (Sp1,))
    w4 = 0.01 * jax.random.normal(ks[4], (1, Sp1), jnp.float32)
    b4 = default_bias(ks[5], Sp1, (1,))
    return dict(w1=w1, b1=b1, w3=w3, b3=b3, w4=w4, b4=b4)


def pack_params(params, state_dim, state_size):
    """Pack all parameters into one (S+1+4, max(D, S+1)) f32 tile (single DMA)."""
    D = state_dim
    Sp1 = state_size + 1
    C = max(D, Sp1, 2)
    p = jnp.zeros((Sp1 + 4, C), jnp.float32)
    p = p.at[:Sp1, :Sp1].set(params["w3"].T)          # x @ W^T layout
    p = p.at[Sp1, :D].set(params["w1"][0])
    p = p.at[Sp1 + 1, :Sp1].set(params["b3"])
    p = p.at[Sp1 + 2, :Sp1].set(params["w4"][0])
    p = p.at[Sp1 + 3, 0].set(params["b1"][0])
    p = p.at[Sp1 + 3, 1].set(params["b4"][0])
    return p


# ----------------------------------------------------------------------------
# Wrapper
# ----------------------------------------------------------------------------
@jax.jit
def critic_forward(packed_params, state, action):
    B = state.shape[0]
    vmem = pl.BlockSpec(memory_space=pltpu.MemorySpace.VMEM)
    return pl.pallas_call(
        critic_kernel,
        out_shape=jax.ShapeDtypeStruct((B, 1), jnp.float32),
        in_specs=[vmem, vmem, vmem],
        out_specs=vmem,
    )(state, action, packed_params)


def critic_ref(params, state, action):
    """Pure-JAX reference of CriticNet.forward for correctness checking."""
    s_a = jnp.concatenate([state, action[:, None, :] + 1.0], axis=1)   # (B,S+1,D)
    h = jax.nn.relu(jnp.einsum("bsd,od->bso", s_a, params["w1"]) + params["b1"])
    h = h.reshape(state.shape[0], -1)                                  # (B,S+1)
    r3 = jax.nn.relu(h @ params["w3"].T + params["b3"])
    return r3 @ params["w4"].T + params["b4"]                          # (B,1)


if __name__ == "__main__":
    key = jax.random.PRNGKey(0)
    k_param, k_state, k_action = jax.random.split(key, 3)

    D = FEATOTALLEN           # state_dim = 15
    S = STATESIZE             # seq length of `state` = 8

    params = init_critic_params(k_param, state_dim=D, state_size=S)
    packed = pack_params(params, state_dim=D, state_size=S)

    state = jax.random.normal(k_state, (BATCH_SIZE, S, D), jnp.float32)
    action = jax.random.normal(k_action, (BATCH_SIZE, D), jnp.float32)

    rew = critic_forward(packed, state, action)
    jax.block_until_ready(rew)

    assert rew.shape == (BATCH_SIZE, 1)

    ref = critic_ref(params, state, action)
    if not bool(jnp.allclose(rew, ref, atol=1e-4, rtol=1e-4)):
        raise AssertionError("Pallas kernel output mismatches pure-JAX reference")

    print("KERNEL_OK")
</pallas_src>

<mosaic_0001>
module attributes {stable_mosaic.version = 11 : i64} {
  func.func @critic_kernel(%arg0: memref<2x8x15xf32, #tpu.memory_space<vmem>>, %arg1: memref<2x15xf32, #tpu.memory_space<vmem>>, %arg2: memref<13x15xf32, #tpu.memory_space<vmem>>, %arg3: memref<2x1xf32, #tpu.memory_space<vmem>>) attributes {dimension_semantics = [], scalar_prefetch = 0 : i64, scratch_operands = 0 : i64, tpu.core_type = #tpu.core_type<tc>} {
    %c0 = arith.constant 0 : index
    %c0_0 = arith.constant 0 : index
    %0 = vector.load %arg2[%c0, %c0_0] : memref<13x15xf32, #tpu.memory_space<vmem>>, vector<9x9xf32>
    %c9 = arith.constant 9 : index
    %c0_1 = arith.constant 0 : index
    %1 = vector.load %arg2[%c9, %c0_1] : memref<13x15xf32, #tpu.memory_space<vmem>>, vector<1x15xf32>
    %c10 = arith.constant 10 : index
    %c0_2 = arith.constant 0 : index
    %2 = vector.load %arg2[%c10, %c0_2] : memref<13x15xf32, #tpu.memory_space<vmem>>, vector<1x9xf32>
    %c11 = arith.constant 11 : index
    %c0_3 = arith.constant 0 : index
    %3 = vector.load %arg2[%c11, %c0_3] : memref<13x15xf32, #tpu.memory_space<vmem>>, vector<1x9xf32>
    %c12 = arith.constant 12 : index
    %c0_4 = arith.constant 0 : index
    %4 = vector.load %arg2[%c12, %c0_4] : memref<13x15xf32, #tpu.memory_space<vmem>>, vector<1x1xf32>
    %c12_5 = arith.constant 12 : index
    %c1 = arith.constant 1 : index
    %5 = vector.load %arg2[%c12_5, %c1] : memref<13x15xf32, #tpu.memory_space<vmem>>, vector<1x1xf32>
    %c0_6 = arith.constant 0 : index
    %c0_7 = arith.constant 0 : index
    %c0_8 = arith.constant 0 : index
    %6 = vector.load %arg0[%c0_6, %c0_7, %c0_8] : memref<2x8x15xf32, #tpu.memory_space<vmem>>, vector<2x8x15xf32>
    %7 = vector.shape_cast %1 : vector<1x15xf32> to vector<1x1x15xf32>
    %8 = vector.broadcast %7 : vector<1x1x15xf32> to vector<2x8x15xf32>
    %9 = arith.mulf %6, %8 : vector<2x8x15xf32>
    %cst = arith.constant dense<0.000000e+00> : vector<2x8xf32>
    %10 = vector.multi_reduction <add>, %9, %cst [2] : vector<2x8x15xf32> to vector<2x8xf32>
    %c0_9 = arith.constant 0 : index
    %c0_10 = arith.constant 0 : index
    %11 = vector.load %arg1[%c0_9, %c0_10] : memref<2x15xf32, #tpu.memory_space<vmem>>, vector<2x15xf32>
    %cst_11 = arith.constant 1.000000e+00 : f32
    %12 = vector.broadcast %cst_11 : f32 to vector<2x15xf32>
    %13 = arith.addf %11, %12 : vector<2x15xf32>
    %14 = vector.broadcast %1 : vector<1x15xf32> to vector<2x15xf32>
    %15 = arith.mulf %13, %14 : vector<2x15xf32>
    %cst_12 = arith.constant dense<0.000000e+00> : vector<2xf32>
    %16 = vector.multi_reduction <add>, %15, %cst_12 [1] : vector<2x15xf32> to vector<2xf32>
    %17 = vector.shape_cast %16 : vector<2xf32> to vector<2x1xf32>
    %18 = tpu.concatenate %10, %17 in 1 : vector<2x8xf32>, vector<2x1xf32> -> vector<2x9xf32>
    %19 = vector.broadcast %4 : vector<1x1xf32> to vector<2x9xf32>
    %20 = arith.addf %18, %19 : vector<2x9xf32>
    %cst_13 = arith.constant 0.000000e+00 : f32
    %21 = vector.broadcast %cst_13 : f32 to vector<2x9xf32>
    %22 = arith.maximumf %20, %21 : vector<2x9xf32>
    %cst_14 = arith.constant dense<0.000000e+00> : vector<2x9xf32>
    %23 = tpu.matmul %22, %0, %cst_14 {dimension_numbers = #tpu.dot_dimension_numbers<[1], [0], [0], [1], [0, 0, 1, 1], [], []>} : vector<2x9xf32>, vector<9x9xf32>, vector<2x9xf32> -> vector<2x9xf32>
    %24 = vector.broadcast %2 : vector<1x9xf32> to vector<2x9xf32>
    %25 = arith.addf %23, %24 : vector<2x9xf32>
    %cst_15 = arith.constant 0.000000e+00 : f32
    %26 = vector.broadcast %cst_15 : f32 to vector<2x9xf32>
    %27 = arith.maximumf %25, %26 : vector<2x9xf32>
    %28 = vector.broadcast %3 : vector<1x9xf32> to vector<2x9xf32>
    %29 = arith.mulf %27, %28 : vector<2x9xf32>
    %cst_16 = arith.constant dense<0.000000e+00> : vector<2xf32>
    %30 = vector.multi_reduction <add>, %29, %cst_16 [1] : vector<2x9xf32> to vector<2xf32>
    %31 = vector.shape_cast %30 : vector<2xf32> to vector<2x1xf32>
    %32 = vector.broadcast %5 : vector<1x1xf32> to vector<2x1xf32>
    %33 = arith.addf %31, %32 : vector<2x1xf32>
    %c0_17 = arith.constant 0 : index
    %c0_18 = arith.constant 0 : index
    %34 = vector.load %arg3[%c0_17, %c0_18] : memref<2x1xf32, #tpu.memory_space<vmem>>, vector<2x1xf32>
    tpu.vector_store %arg3[%c0_17, %c0_18], %33 {strides = array<i32>} : memref<2x1xf32, #tpu.memory_space<vmem>>, vector<2x1xf32>,
    return
  }
}

</mosaic_0001>

<bundles_post_ra>
// kernel: critic_forward.1
= control target key start
LH: loop header
LB: loop body
LE: loop exit
PB: predicated region body
PF: predicated region fallthrough
CT: control target
= control target key end

     0   :  { %8 = vsyncpa [#allocation3], 0  ;;  %s339_s0 = inlined_call_operand.hbm [shape: f32[2,8,15], index: 0, kind: input, shape index: {}]   ;;  %s340_s1 = inlined_call_operand.vmem [shape: f32[2,15], index: 1, kind: input, shape index: {}]   ;;  %s341_s2 = inlined_call_operand.hbm [shape: f32[13,15], index: 2, kind: input, shape index: {}]   ;;  %s342_s3 = inlined_call_operand.vmem [shape: f32[2,1], index: 3, kind: output, shape index: {}]  }
   0x1   :  { %9 = vsyncpa [#allocation5], 0  ;;  %s280_s12 = smov [#allocation2]   ;;  %s232_s16 = scalar_lea.hbm %s339_s0, 256 }
   0x2   :  { %s15_s13 = sshll.u32 %s280_s12, 4  ;;  %p233_p0 = scmp.ne.s32.totalorder %s339_s0, %s232_s16  ;;  %s16_s13 = int_to_ptr.vmem [resolvable:$true] %s15_s13 }
   0x3   :  { %p236_p1 = scmp.lt.u32.totalorder %s232_s16, %s339_s0 }
   0x5   :  { %p238_p2 = pnand %p236_p1, %p233_p0 }
   0x7   :  { %241 = shalt.err (!%p238_p2)
}
   0x8   :  { %s242_s21 = scalar_lea.vmem %s16_s13, 256  ;;  %p247_p4 = scmp.lt.s32.totalorder %s16_s13, %s16_s13 }
   0x9   :  { %p243_p3 = scmp.ne.s32.totalorder %s16_s13, %s242_s21  ;;  %p248_p5 = scmp.lt.s32.totalorder %s242_s21, %s242_s21 }
   0xb   :  { %p249_p6 = por %p248_p5, %p247_p4 }
   0xd   :  { %p250_p7 = pnand %p249_p6, %p243_p3 }
   0xf   :  { %253 = shalt.err (!%p250_p7)
}
  0x10   :  { %s281_s22 = smov 128   ;;  %s282_s23 = smov 8  }
  0x11   :  { %21 = dma.hbm_to_vmem [thread:$0]  %s339_s0, 256, %s16_s13, [#allocation3], %s281_s22, %s281_s22, %s282_s23  }
  0x12   :  { %s283_s26 = smov [#allocation4]   ;;  %s254_s30 = scalar_lea.hbm %s341_s2, 256 }
  0x13   :  { %s29_s27 = sshll.u32 %s283_s26, 4  ;;  %p255_p8 = scmp.ne.s32.totalorder %s341_s2, %s254_s30  ;;  %s30_s27 = int_to_ptr.vmem [resolvable:$true] %s29_s27 }
  0x14   :  { %p258_p9 = scmp.lt.u32.totalorder %s254_s30, %s341_s2 }
  0x16   :  { %p260_p10 = pnand %p258_p9, %p255_p8 }
  0x18   :  { %263 = shalt.err (!%p260_p10)
}
  0x19   :  { %s264_s8 = scalar_lea.vmem %s30_s27, 256  ;;  %p269_p12 = scmp.lt.s32.totalorder %s30_s27, %s30_s27 }
  0x1a   :  { %p265_p11 = scmp.ne.s32.totalorder %s30_s27, %s264_s8  ;;  %p270_p13 = scmp.lt.s32.totalorder %s264_s8, %s264_s8 }
  0x1c   :  { %p271_p0 = por %p270_p13, %p269_p12 }
  0x1e   :  { %p272_p1 = pnand %p271_p0, %p265_p11 }
  0x20   :  { %275 = shalt.err (!%p272_p1)
}
  0x21   :  { %35 = dma.hbm_to_vmem [thread:$0]  %s341_s2, 256, %s30_s27, [#allocation5], %s281_s22, %s281_s22, %s282_s23  }
  0x22   :  { %276 = dma.done.wait [#allocation3], 256  }
  0x23   :  { %277 = vsyncadd [#allocation3], 4294967040 }
  0x24   :  { %278 = dma.done.wait [#allocation5], 256  }
  0x25   :  { %279 = vsyncadd [#allocation5], 4294967040  ;;  %v72_v0 = vlaneseq  ;;  %v202_v3 = vld [vmem:[#allocation4 + $0x9] ss:$0 sm:$0xff]  ;;  %v48_v4 = vld [vmem:[#allocation2] sm:$0xff]  ;;  %vm56_vm0 = vcmask 121856  }
  0x26   :  { %v49_v5 = vld [vmem:[#allocation2 + $0x8] sm:$0xff]  ;;  %v54_v6 = vmul.f32 %v202_v3, %v48_v4  ;;  %v63_v8 = vld [vmem:[%s340_s1] sm:$0x3]  ;;  %v47_v9 = vld [vmem:[#allocation4 + $0xc] sm:$0x1]  ;;  %vm66_vm1 = vcmask 115712  }
  0x27   :  { %v75_v1 = vshrl.u32 %v72_v0, 7  ;;  %v55_v7 = vmul.f32 %v202_v3, %v49_v5  ;;  %v64_v10 = vadd.f32 1.0, %v63_v8  ;;  %221 = vpush %v47_v9  ;;  %v42_v16 = vld [vmem:[#allocation4] sm:$0xff]  ;;  %v43_v17 = vld [vmem:[#allocation4 + $0x8] sm:$0x1]  ;;  %vm101_vm2 = vcmask 1040384  }
  0x28   :  { %v57_v12 = vsel %vm56_vm0, %v54_v6, 0.0  ;;  %v218_v18 = vpack.c.bf16 %v43_v17, %v42_v16  ;;  %v284_v19 = vmov 0.0|0.0   ;;  %vm285_vm3 = vmmov 1   ;;  %v203_v33 = vld [vmem:[#allocation4 + $0xa] ss:$0 sm:$0xff]  ;;  %s288_s2 = smov 127  }
  0x29   :  { %v187_v2 = vsub.s32 0, %v75_v1  ;;  %58 = vadd.xlane.f32.xlu0 %v57_v12  ;;  %v65_v13 = vmul.f32 %v202_v3, %v64_v10  ;;  %v60_v14 = vsel %vm56_vm0, %v55_v7, 0.0  ;;  %217 = vmatprep.subr.bf16.mxu0 %v284_v19  ;;  %vm219_vm4 = vmpackc.low %vm101_vm2, %vm285_vm3  ;;  %vm286_vm5 = vmmov 0   ;;  %v206_v37 = vld [vmem:[#allocation4 + $0xb] ss:$0 sm:$0xff] }
  0x2a   :  { %220 = vmatpush3.bf16.msk.msra.mxu0 %vm219_vm4, %v218_v18  ;;  %v287_v20 = vmov 0.0   ;;  %v73_v21 = vand.u32 127, %v72_v0  ;;  %vm82_vm6 = vcmask 1041409   ;;  %vm85_vm7 = vcmask 64512  }
  0x2b   :  { %v188_v11 = vrot.slane %v47_v9, %v187_v2  ;;  %v67_v15 = vsel %vm66_vm1, %v65_v13, 0.0  ;;  %214 = vmatprep.mubr.msk.f32.mxu0 %vm286_vm5, %v287_v20  ;;  %vm97_vm8 = vcmask 72704   ;;  %vm181_vm9 = vcmask 66560  }
  0x2c   :  { %68 = vadd.xlane.f32.xlu1 %v67_v15  ;;  %v76_v23 = vsub.s32 %v73_v21, %v75_v1  ;;  %vm194_vm10 = vcmask 1024  }
  0x2d   :  { %61 = vadd.xlane.f32.xlu0 %v60_v14 }
  0x58   :  { %s222_s1 = spop %221 }
  0x59   :  { %v89_v28 = vstv %s222_s1 }
  0xb6   :  { %v59_v22 = vpop.xlane.xlu0 %58 }
  0xb7   :  { %v77_v25 = vrot.slane %v59_v22, %v76_v23 }
  0xb9   :  { %v69_v27 = vpop.xlane.xlu1 %68 }
  0xba   :  { %v62_v24 = vpop.xlane.xlu0 %61 }
  0xbb   :  { %v81_v26 = vrot.slane %v62_v24, %v76_v23 }
  0xbd   :  { %v83_v29 = vsel %vm82_vm6, %v81_v26, %v77_v25 }
  0xbe   :  { %v86_v30 = vsel %vm85_vm7, %v83_v29, %v69_v27 }
  0xbf   :  { %v91_v31 = vadd.f32 %v89_v28, %v86_v30 }
  0xc1   :  { %v92_v32 = vmax.f32 %v91_v31, 0.0 }
  0xc3   :  { %215 = vmatmul.mubr.msk.f32.vlgmr.msra.gmra.mrb[0].mxu0 %vm97_vm8, %v92_v32 }
 0x196   :  { %v171_v34 = vpop.f32.mrb[0].mxu0 }
 0x197   :  { %v172_v35 = vadd.f32 %v203_v33, %v171_v34  ;;  %v216_v36 = vpop.f32.mrb[1].mxu0 }
 0x199   :  { %v175_v38 = vmax.f32 %v172_v35, 0.0 }
 0x19b   :  { %v180_v39 = vmul.f32 %v206_v37, %v175_v38 }
 0x19d   :  { %v182_v40 = vsel %vm181_vm9, %v180_v39, 0.0 }
 0x19e   :  { %183 = vadd.xlane.f32.xlu1 %v182_v40 }
 0x22b   :  { %v184_v41 = vpop.xlane.xlu1 %183 }
 0x22c   :  { %v189_v42 = vadd.f32 %v188_v11, %v184_v41 }
 0x22e   :  { %191 = vrot.lane.b32.xlu0 %v189_v42, %s288_s2 }
 0x2a0   :  { %v192_v43 = vpop.permute.xlu0 %191 }
 0x2a1   :  { %195 = vst.msk [vmem:[%s342_s3] sm:$0x3] %vm194_vm10, %v192_v43 }
 0x2a2   :  { %200 = vsyncpa [#allocation3], 1 }
 0x2a3   :  { %201 = vsyncpa [#allocation5], 1 }

</bundles_post_ra>
